<compile_context>
chip_gen: v6e
topology: v6e:2x2x1
jax: 0.10.0
libtpu: 0.0.40
codegen_flags: <defaults>
</compile_context>

<pallas_src>
import numpy as np
import jax
import jax.numpy as jnp
from jax.experimental import pallas as pl
from jax.experimental.pallas import tpu as pltpu

NUM_LAYERS = 4


def decoder_kernel(x_ref, h0_ref, enc_ref,
                   win0_ref, winr_ref, whh_ref, b_ref,
                   wo1_ref, wo2_ref, bout_ref,
                   out_ref, hn_ref):
    """Single-timestep 4-layer fused-bidirectional RNN cell + attention + Linear.

    All operands are tiny and fully VMEM-resident. Weights are indexed per layer
    at the point of use; every matmul is activation @ W (weights pre-transposed
    on the host), no in-kernel transposes.
    """
    H = h0_ref.shape[-1]
    x = x_ref[...]                                   # (B, E)

    # ---- hoisted recurrent terms: 8 independent tiny dots, issued back-to-back
    #      (off the serial layer-chain critical path, MXU pipelines them) ----
    r = []
    for layer in range(NUM_LAYERS):
        r_f = jnp.dot(h0_ref[2 * layer], whh_ref[2 * layer],
                      preferred_element_type=jnp.float32)          # (B, H)
        r_b = jnp.dot(h0_ref[2 * layer + 1], whh_ref[2 * layer + 1],
                      preferred_element_type=jnp.float32)          # (B, H)
        r.append(jnp.concatenate([r_f, r_b], axis=-1) + b_ref[layer])  # (B, 2H)

    # ---- serial 4-layer bidirectional vanilla RNN, single timestep ----
    layer_in = x
    h_pair = x                                       # overwritten below
    for layer in range(NUM_LAYERS):
        if layer == 0:
            w_in = win0_ref[...]                     # (E, 2H)   [fwd | bwd] fused
        else:
            w_in = winr_ref[layer - 1]               # (2H, 2H)  [fwd | bwd] fused
        z = jnp.dot(layer_in, w_in, preferred_element_type=jnp.float32)
        h_pair = jnp.tanh(z + r[layer])              # (B, 2H): [:, :H]=fwd, [:, H:]=bwd
        hn_ref[2 * layer] = h_pair[:, :H]            # PyTorch-layout h_n, written in-kernel
        hn_ref[2 * layer + 1] = h_pair[:, H:]
        layer_in = h_pair                            # next layer input (no concat)

    # ---- attention: scores -> softmax over S -> weighted sum of encoder ----
    enc = enc_ref[...]                               # (B, S, E)
    scores = jnp.sum(enc * x[:, None, :], axis=2)    # lane reduce over E -> (B, S)
    m = jnp.max(scores, axis=-1, keepdims=True)
    p = jnp.exp(scores - m)
    att = p / jnp.sum(p, axis=-1, keepdims=True)     # (B, S), exact softmax
    att_out = jnp.sum(att[:, :, None] * enc, axis=1) # sublane reduce over S -> (B, E)

    # ---- output Linear(2H, E): concat removed, rnn_out=h_f+h_b folded into Wo1 ----
    out_ref[...] = (
        jnp.dot(h_pair, wo1_ref[...], preferred_element_type=jnp.float32)
        + jnp.dot(att_out, wo2_ref[...], preferred_element_type=jnp.float32)
        + bout_ref[...])


def decoder_forward(x, hidden, encoder_output, kp):
    B, T, E = x.shape
    assert T == 1, "module semantics (squeeze(2)) require T == 1"
    H = kp["whh_t"].shape[-1]
    assert E == H, "Linear(2H, E) on cat([rnn(H), attn(E)]) requires E == H"
    x2d = x[:, 0, :]                                 # metadata-only squeeze (T == 1)

    vmem = pl.BlockSpec(memory_space=pltpu.MemorySpace.VMEM)
    out2d, h_n = pl.pallas_call(
        decoder_kernel,
        out_shape=(jax.ShapeDtypeStruct((B, E), jnp.float32),
                   jax.ShapeDtypeStruct((2 * NUM_LAYERS, B, H), jnp.float32)),
        in_specs=[vmem] * 10,
        out_specs=(vmem, vmem),
    )(x2d, hidden, encoder_output,
      kp["w_in_l0"], kp["w_in_rest"], kp["whh_t"], kp["b_fused"],
      kp["wo1d"], kp["wo2"], kp["b_out"])

    return out2d[:, None, :], h_n


def init_raw_params(key, hidden_size, embed_size):
    """Raw PyTorch-style parameters (same layout as nn.RNN / nn.Linear)."""
    H, E = hidden_size, embed_size
    k = 1.0 / np.sqrt(H)
    ks = jax.random.split(key, 8)
    u = lambda kk, shape, s: jax.random.uniform(kk, shape, jnp.float32, -s, s)
    w_ih_l0 = u(ks[0], (2, H, E), k)                      # layer 0 (fwd, bwd)
    w_ih_rest = u(ks[1], (NUM_LAYERS - 1, 2, H, 2 * H), k)
    w_hh = u(ks[2], (NUM_LAYERS, 2, H, H), k)
    b_ih = u(ks[3], (NUM_LAYERS, 2, H), k)
    b_hh = u(ks[4], (NUM_LAYERS, 2, H), k)
    ko = 1.0 / np.sqrt(2 * H)
    w_out = u(ks[5], (E, 2 * H), ko)
    b_out = u(ks[6], (1, E), ko)
    return dict(w_ih_l0=w_ih_l0, w_ih_rest=w_ih_rest, w_hh=w_hh,
                b_ih=b_ih, b_hh=b_hh, w_out=w_out, b_out=b_out)


def pack_params(p):
    """One-time host-side re-layout: pre-transpose, fuse fwd/bwd input weights,
    per-direction recurrent weights, split+double the output Linear so the kernel
    has no transposes and no concats on the serial path."""
    H = p["w_hh"].shape[-1]
    E = p["w_ih_l0"].shape[-1]
    assert E == H, "Linear(2H, E) on cat([rnn(H), attn(E)]) requires E == H"

    # layer-0 fused input weights: (E, 2H) = [W_fwd.T | W_bwd.T]
    w_in_l0 = jnp.concatenate([p["w_ih_l0"][0].T, p["w_ih_l0"][1].T], axis=1)
    # layers 1..3 fused input weights: (3, 2H, 2H)
    w_in_rest = jnp.stack(
        [jnp.concatenate([p["w_ih_rest"][l, 0].T, p["w_ih_rest"][l, 1].T], axis=1)
         for l in range(NUM_LAYERS - 1)], axis=0)
    # per-direction pre-transposed recurrent weights: (8, H, H), index 2*layer + dir
    whh_t = jnp.stack([p["w_hh"][l, d].T
                       for l in range(NUM_LAYERS) for d in range(2)], axis=0)
    # fused biases: (4, 1, 2H) = [b_fwd | b_bwd] with b = b_ih + b_hh
    b_fused = (p["b_ih"] + p["b_hh"]).reshape(NUM_LAYERS, 1, 2 * H)
    # output Linear split: rnn_out = h_f + h_b folded via doubled first-half weights
    wo1 = p["w_out"][:, :H].T                              # (H, E)
    wo1d = jnp.concatenate([wo1, wo1], axis=0)             # (2H, E)
    wo2 = p["w_out"][:, H:].T                              # (E, E)   (requires E == H)
    b_out = p["b_out"].reshape(1, E)
    return dict(w_in_l0=w_in_l0, w_in_rest=w_in_rest, whh_t=whh_t,
                b_fused=b_fused, wo1d=wo1d, wo2=wo2, b_out=b_out)


def decoder_reference(x, hidden, enc, p):
    """Pure-JAX reference mirroring the PyTorch forward (T == 1), raw params."""
    xq = x[:, 0, :]
    b = p["b_ih"] + p["b_hh"]
    layer_in = xq
    hn = []
    for layer in range(NUM_LAYERS):
        if layer == 0:
            w_f, w_b = p["w_ih_l0"][0], p["w_ih_l0"][1]
        else:
            w_f, w_b = p["w_ih_rest"][layer - 1, 0], p["w_ih_rest"][layer - 1, 1]
        h_f = jnp.tanh(layer_in @ w_f.T + hidden[2 * layer] @ p["w_hh"][layer, 0].T
                       + b[layer, 0])
        h_b = jnp.tanh(layer_in @ w_b.T + hidden[2 * layer + 1] @ p["w_hh"][layer, 1].T
                       + b[layer, 1])
        hn += [h_f, h_b]
        layer_in = jnp.concatenate([h_f, h_b], axis=-1)
    rnn_out = h_f + h_b
    scores = jnp.einsum("bse,be->bs", enc, xq)
    att = jax.nn.softmax(scores, axis=1)
    att_out = jnp.einsum("bs,bse->be", att, enc)
    out = jnp.concatenate([rnn_out, att_out], axis=-1) @ p["w_out"].T + p["b_out"]
    return out[:, None, :], jnp.stack(hn, axis=0)


if __name__ == "__main__":
    B, S, H, E, T = 2, 8, 32, 32, 1   # embed_size must equal hidden_size (see header)

    root = jax.random.PRNGKey(0)
    kp, kx, kh, ke = jax.random.split(root, 4)
    raw = init_raw_params(kp, H, E)
    packed = pack_params(raw)

    x = jax.random.normal(kx, (B, T, E), jnp.float32)
    hidden = jax.random.normal(kh, (2 * NUM_LAYERS, B, H), jnp.float32)
    encoder_output = jax.random.normal(ke, (B, S, E), jnp.float32)

    out, h_n = decoder_forward(x, hidden, encoder_output, packed)
    out = jax.block_until_ready(out)
    h_n = jax.block_until_ready(h_n)

    ref_out, ref_hn = decoder_reference(x, hidden, encoder_output, raw)
    assert out.shape == (B, T, E) and h_n.shape == (2 * NUM_LAYERS, B, H)
    np.testing.assert_allclose(np.asarray(out), np.asarray(ref_out), rtol=1e-4, atol=1e-5)
    np.testing.assert_allclose(np.asarray(h_n), np.asarray(ref_hn), rtol=1e-4, atol=1e-5)

    print("KERNEL_OK")
</pallas_src>

<mosaic_0001>
module attributes {stable_mosaic.version = 11 : i64} {
  func.func @decoder_kernel(%arg0: memref<2x32xf32, #tpu.memory_space<vmem>>, %arg1: memref<8x2x32xf32, #tpu.memory_space<vmem>>, %arg2: memref<2x8x32xf32, #tpu.memory_space<vmem>>, %arg3: memref<32x64xf32, #tpu.memory_space<vmem>>, %arg4: memref<3x64x64xf32, #tpu.memory_space<vmem>>, %arg5: memref<8x32x32xf32, #tpu.memory_space<vmem>>, %arg6: memref<4x1x64xf32, #tpu.memory_space<vmem>>, %arg7: memref<64x32xf32, #tpu.memory_space<vmem>>, %arg8: memref<32x32xf32, #tpu.memory_space<vmem>>, %arg9: memref<1x32xf32, #tpu.memory_space<vmem>>, %arg10: memref<2x32xf32, #tpu.memory_space<vmem>>, %arg11: memref<8x2x32xf32, #tpu.memory_space<vmem>>) attributes {dimension_semantics = [], scalar_prefetch = 0 : i64, scratch_operands = 0 : i64, tpu.core_type = #tpu.core_type<tc>} {
    %c0 = arith.constant 0 : index
    %c0_0 = arith.constant 0 : index
    %0 = vector.load %arg0[%c0, %c0_0] : memref<2x32xf32, #tpu.memory_space<vmem>>, vector<2x32xf32>
    %c0_1 = arith.constant 0 : index
    %c0_2 = arith.constant 0 : index
    %c0_3 = arith.constant 0 : index
    %1 = vector.load %arg1[%c0_1, %c0_2, %c0_3] : memref<8x2x32xf32, #tpu.memory_space<vmem>>, vector<1x2x32xf32>
    %2 = vector.shape_cast %1 : vector<1x2x32xf32> to vector<2x32xf32>
    %c0_4 = arith.constant 0 : index
    %c0_5 = arith.constant 0 : index
    %c0_6 = arith.constant 0 : index
    %3 = vector.load %arg5[%c0_4, %c0_5, %c0_6] : memref<8x32x32xf32, #tpu.memory_space<vmem>>, vector<1x32x32xf32>
    %4 = vector.shape_cast %3 : vector<1x32x32xf32> to vector<32x32xf32>
    %cst = arith.constant dense<0.000000e+00> : vector<2x32xf32>
    %5 = tpu.matmul %2, %4, %cst {dimension_numbers = #tpu.dot_dimension_numbers<[1], [0], [0], [1], [0, 0, 1, 1], [], []>} : vector<2x32xf32>, vector<32x32xf32>, vector<2x32xf32> -> vector<2x32xf32>
    %c1 = arith.constant 1 : index
    %c0_7 = arith.constant 0 : index
    %c0_8 = arith.constant 0 : index
    %6 = vector.load %arg1[%c1, %c0_7, %c0_8] : memref<8x2x32xf32, #tpu.memory_space<vmem>>, vector<1x2x32xf32>
    %7 = vector.shape_cast %6 : vector<1x2x32xf32> to vector<2x32xf32>
    %c1_9 = arith.constant 1 : index
    %c0_10 = arith.constant 0 : index
    %c0_11 = arith.constant 0 : index
    %8 = vector.load %arg5[%c1_9, %c0_10, %c0_11] : memref<8x32x32xf32, #tpu.memory_space<vmem>>, vector<1x32x32xf32>
    %9 = vector.shape_cast %8 : vector<1x32x32xf32> to vector<32x32xf32>
    %cst_12 = arith.constant dense<0.000000e+00> : vector<2x32xf32>
    %10 = tpu.matmul %7, %9, %cst_12 {dimension_numbers = #tpu.dot_dimension_numbers<[1], [0], [0], [1], [0, 0, 1, 1], [], []>} : vector<2x32xf32>, vector<32x32xf32>, vector<2x32xf32> -> vector<2x32xf32>
    %11 = tpu.concatenate %5, %10 in 1 : vector<2x32xf32>, vector<2x32xf32> -> vector<2x64xf32>
    %c0_13 = arith.constant 0 : index
    %c0_14 = arith.constant 0 : index
    %c0_15 = arith.constant 0 : index
    %12 = vector.load %arg6[%c0_13, %c0_14, %c0_15] : memref<4x1x64xf32, #tpu.memory_space<vmem>>, vector<1x1x64xf32>
    %13 = vector.shape_cast %12 : vector<1x1x64xf32> to vector<1x64xf32>
    %14 = vector.broadcast %13 : vector<1x64xf32> to vector<2x64xf32>
    %15 = arith.addf %11, %14 : vector<2x64xf32>
    %c2 = arith.constant 2 : index
    %c0_16 = arith.constant 0 : index
    %c0_17 = arith.constant 0 : index
    %16 = vector.load %arg1[%c2, %c0_16, %c0_17] : memref<8x2x32xf32, #tpu.memory_space<vmem>>, vector<1x2x32xf32>
    %17 = vector.shape_cast %16 : vector<1x2x32xf32> to vector<2x32xf32>
    %c2_18 = arith.constant 2 : index
    %c0_19 = arith.constant 0 : index
    %c0_20 = arith.constant 0 : index
    %18 = vector.load %arg5[%c2_18, %c0_19, %c0_20] : memref<8x32x32xf32, #tpu.memory_space<vmem>>, vector<1x32x32xf32>
    %19 = vector.shape_cast %18 : vector<1x32x32xf32> to vector<32x32xf32>
    %cst_21 = arith.constant dense<0.000000e+00> : vector<2x32xf32>
    %20 = tpu.matmul %17, %19, %cst_21 {dimension_numbers = #tpu.dot_dimension_numbers<[1], [0], [0], [1], [0, 0, 1, 1], [], []>} : vector<2x32xf32>, vector<32x32xf32>, vector<2x32xf32> -> vector<2x32xf32>
    %c3 = arith.constant 3 : index
    %c0_22 = arith.constant 0 : index
    %c0_23 = arith.constant 0 : index
    %21 = vector.load %arg1[%c3, %c0_22, %c0_23] : memref<8x2x32xf32, #tpu.memory_space<vmem>>, vector<1x2x32xf32>
    %22 = vector.shape_cast %21 : vector<1x2x32xf32> to vector<2x32xf32>
    %c3_24 = arith.constant 3 : index
    %c0_25 = arith.constant 0 : index
    %c0_26 = arith.constant 0 : index
    %23 = vector.load %arg5[%c3_24, %c0_25, %c0_26] : memref<8x32x32xf32, #tpu.memory_space<vmem>>, vector<1x32x32xf32>
    %24 = vector.shape_cast %23 : vector<1x32x32xf32> to vector<32x32xf32>
    %cst_27 = arith.constant dense<0.000000e+00> : vector<2x32xf32>
    %25 = tpu.matmul %22, %24, %cst_27 {dimension_numbers = #tpu.dot_dimension_numbers<[1], [0], [0], [1], [0, 0, 1, 1], [], []>} : vector<2x32xf32>, vector<32x32xf32>, vector<2x32xf32> -> vector<2x32xf32>
    %26 = tpu.concatenate %20, %25 in 1 : vector<2x32xf32>, vector<2x32xf32> -> vector<2x64xf32>
    %c1_28 = arith.constant 1 : index
    %c0_29 = arith.constant 0 : index
    %c0_30 = arith.constant 0 : index
    %27 = vector.load %arg6[%c1_28, %c0_29, %c0_30] : memref<4x1x64xf32, #tpu.memory_space<vmem>>, vector<1x1x64xf32>
    %28 = vector.shape_cast %27 : vector<1x1x64xf32> to vector<1x64xf32>
    %29 = vector.broadcast %28 : vector<1x64xf32> to vector<2x64xf32>
    %30 = arith.addf %26, %29 : vector<2x64xf32>
    %c4 = arith.constant 4 : index
    %c0_31 = arith.constant 0 : index
    %c0_32 = arith.constant 0 : index
    %31 = vector.load %arg1[%c4, %c0_31, %c0_32] : memref<8x2x32xf32, #tpu.memory_space<vmem>>, vector<1x2x32xf32>
    %32 = vector.shape_cast %31 : vector<1x2x32xf32> to vector<2x32xf32>
    %c4_33 = arith.constant 4 : index
    %c0_34 = arith.constant 0 : index
    %c0_35 = arith.constant 0 : index
    %33 = vector.load %arg5[%c4_33, %c0_34, %c0_35] : memref<8x32x32xf32, #tpu.memory_space<vmem>>, vector<1x32x32xf32>
    %34 = vector.shape_cast %33 : vector<1x32x32xf32> to vector<32x32xf32>
    %cst_36 = arith.constant dense<0.000000e+00> : vector<2x32xf32>
    %35 = tpu.matmul %32, %34, %cst_36 {dimension_numbers = #tpu.dot_dimension_numbers<[1], [0], [0], [1], [0, 0, 1, 1], [], []>} : vector<2x32xf32>, vector<32x32xf32>, vector<2x32xf32> -> vector<2x32xf32>
    %c5 = arith.constant 5 : index
    %c0_37 = arith.constant 0 : index
    %c0_38 = arith.constant 0 : index
    %36 = vector.load %arg1[%c5, %c0_37, %c0_38] : memref<8x2x32xf32, #tpu.memory_space<vmem>>, vector<1x2x32xf32>
    %37 = vector.shape_cast %36 : vector<1x2x32xf32> to vector<2x32xf32>
    %c5_39 = arith.constant 5 : index
    %c0_40 = arith.constant 0 : index
    %c0_41 = arith.constant 0 : index
    %38 = vector.load %arg5[%c5_39, %c0_40, %c0_41] : memref<8x32x32xf32, #tpu.memory_space<vmem>>, vector<1x32x32xf32>
    %39 = vector.shape_cast %38 : vector<1x32x32xf32> to vector<32x32xf32>
    %cst_42 = arith.constant dense<0.000000e+00> : vector<2x32xf32>
    %40 = tpu.matmul %37, %39, %cst_42 {dimension_numbers = #tpu.dot_dimension_numbers<[1], [0], [0], [1], [0, 0, 1, 1], [], []>} : vector<2x32xf32>, vector<32x32xf32>, vector<2x32xf32> -> vector<2x32xf32>
    %41 = tpu.concatenate %35, %40 in 1 : vector<2x32xf32>, vector<2x32xf32> -> vector<2x64xf32>
    %c2_43 = arith.constant 2 : index
    %c0_44 = arith.constant 0 : index
    %c0_45 = arith.constant 0 : index
    %42 = vector.load %arg6[%c2_43, %c0_44, %c0_45] : memref<4x1x64xf32, #tpu.memory_space<vmem>>, vector<1x1x64xf32>
    %43 = vector.shape_cast %42 : vector<1x1x64xf32> to vector<1x64xf32>
    %44 = vector.broadcast %43 : vector<1x64xf32> to vector<2x64xf32>
    %45 = arith.addf %41, %44 : vector<2x64xf32>
    %c6 = arith.constant 6 : index
    %c0_46 = arith.constant 0 : index
    %c0_47 = arith.constant 0 : index
    %46 = vector.load %arg1[%c6, %c0_46, %c0_47] : memref<8x2x32xf32, #tpu.memory_space<vmem>>, vector<1x2x32xf32>
    %47 = vector.shape_cast %46 : vector<1x2x32xf32> to vector<2x32xf32>
    %c6_48 = arith.constant 6 : index
    %c0_49 = arith.constant 0 : index
    %c0_50 = arith.constant 0 : index
    %48 = vector.load %arg5[%c6_48, %c0_49, %c0_50] : memref<8x32x32xf32, #tpu.memory_space<vmem>>, vector<1x32x32xf32>
    %49 = vector.shape_cast %48 : vector<1x32x32xf32> to vector<32x32xf32>
    %cst_51 = arith.constant dense<0.000000e+00> : vector<2x32xf32>
    %50 = tpu.matmul %47, %49, %cst_51 {dimension_numbers = #tpu.dot_dimension_numbers<[1], [0], [0], [1], [0, 0, 1, 1], [], []>} : vector<2x32xf32>, vector<32x32xf32>, vector<2x32xf32> -> vector<2x32xf32>
    %c7 = arith.constant 7 : index
    %c0_52 = arith.constant 0 : index
    %c0_53 = arith.constant 0 : index
    %51 = vector.load %arg1[%c7, %c0_52, %c0_53] : memref<8x2x32xf32, #tpu.memory_space<vmem>>, vector<1x2x32xf32>
    %52 = vector.shape_cast %51 : vector<1x2x32xf32> to vector<2x32xf32>
    %c7_54 = arith.constant 7 : index
    %c0_55 = arith.constant 0 : index
    %c0_56 = arith.constant 0 : index
    %53 = vector.load %arg5[%c7_54, %c0_55, %c0_56] : memref<8x32x32xf32, #tpu.memory_space<vmem>>, vector<1x32x32xf32>
    %54 = vector.shape_cast %53 : vector<1x32x32xf32> to vector<32x32xf32>
    %cst_57 = arith.constant dense<0.000000e+00> : vector<2x32xf32>
    %55 = tpu.matmul %52, %54, %cst_57 {dimension_numbers = #tpu.dot_dimension_numbers<[1], [0], [0], [1], [0, 0, 1, 1], [], []>} : vector<2x32xf32>, vector<32x32xf32>, vector<2x32xf32> -> vector<2x32xf32>
    %56 = tpu.concatenate %50, %55 in 1 : vector<2x32xf32>, vector<2x32xf32> -> vector<2x64xf32>
    %c3_58 = arith.constant 3 : index
    %c0_59 = arith.constant 0 : index
    %c0_60 = arith.constant 0 : index
    %57 = vector.load %arg6[%c3_58, %c0_59, %c0_60] : memref<4x1x64xf32, #tpu.memory_space<vmem>>, vector<1x1x64xf32>
    %58 = vector.shape_cast %57 : vector<1x1x64xf32> to vector<1x64xf32>
    %59 = vector.broadcast %58 : vector<1x64xf32> to vector<2x64xf32>
    %60 = arith.addf %56, %59 : vector<2x64xf32>
    %c0_61 = arith.constant 0 : index
    %c0_62 = arith.constant 0 : index
    %61 = vector.load %arg3[%c0_61, %c0_62] : memref<32x64xf32, #tpu.memory_space<vmem>>, vector<32x64xf32>
    %cst_63 = arith.constant dense<0.000000e+00> : vector<2x64xf32>
    %62 = tpu.matmul %0, %61, %cst_63 {dimension_numbers = #tpu.dot_dimension_numbers<[1], [0], [0], [1], [0, 0, 1, 1], [], []>} : vector<2x32xf32>, vector<32x64xf32>, vector<2x64xf32> -> vector<2x64xf32>
    %63 = arith.addf %62, %15 : vector<2x64xf32>
    %64 = math.tanh %63 : vector<2x64xf32>
    %65 = vector.extract_strided_slice %64 {offsets = [0, 0], sizes = [2, 32], strides = [1, 1]} : vector<2x64xf32> to vector<2x32xf32>
    %c0_64 = arith.constant 0 : index
    %c0_65 = arith.constant 0 : index
    %c0_66 = arith.constant 0 : index
    %66 = vector.load %arg11[%c0_64, %c0_65, %c0_66] : memref<8x2x32xf32, #tpu.memory_space<vmem>>, vector<1x2x32xf32>
    %67 = vector.shape_cast %66 : vector<1x2x32xf32> to vector<2x32xf32>
    %68 = vector.shape_cast %65 : vector<2x32xf32> to vector<1x2x32xf32>
    tpu.vector_store %arg11[%c0_64, %c0_65, %c0_66], %68 {strides = array<i32>} : memref<8x2x32xf32, #tpu.memory_space<vmem>>, vector<1x2x32xf32>,
    %69 = vector.extract_strided_slice %64 {offsets = [0, 32], sizes = [2, 32], strides = [1, 1]} : vector<2x64xf32> to vector<2x32xf32>
    %c1_67 = arith.constant 1 : index
    %c0_68 = arith.constant 0 : index
    %c0_69 = arith.constant 0 : index
    %70 = vector.load %arg11[%c1_67, %c0_68, %c0_69] : memref<8x2x32xf32, #tpu.memory_space<vmem>>, vector<1x2x32xf32>
    %71 = vector.shape_cast %70 : vector<1x2x32xf32> to vector<2x32xf32>
    %72 = vector.shape_cast %69 : vector<2x32xf32> to vector<1x2x32xf32>
    tpu.vector_store %arg11[%c1_67, %c0_68, %c0_69], %72 {strides = array<i32>} : memref<8x2x32xf32, #tpu.memory_space<vmem>>, vector<1x2x32xf32>,
    %c0_70 = arith.constant 0 : index
    %c0_71 = arith.constant 0 : index
    %c0_72 = arith.constant 0 : index
    %73 = vector.load %arg4[%c0_70, %c0_71, %c0_72] : memref<3x64x64xf32, #tpu.memory_space<vmem>>, vector<1x64x64xf32>
    %74 = vector.shape_cast %73 : vector<1x64x64xf32> to vector<64x64xf32>
    %cst_73 = arith.constant dense<0.000000e+00> : vector<2x64xf32>
    %75 = tpu.matmul %64, %74, %cst_73 {dimension_numbers = #tpu.dot_dimension_numbers<[1], [0], [0], [1], [0, 0, 1, 1], [], []>} : vector<2x64xf32>, vector<64x64xf32>, vector<2x64xf32> -> vector<2x64xf32>
    %76 = arith.addf %75, %30 : vector<2x64xf32>
    %77 = math.tanh %76 : vector<2x64xf32>
    %78 = vector.extract_strided_slice %77 {offsets = [0, 0], sizes = [2, 32], strides = [1, 1]} : vector<2x64xf32> to vector<2x32xf32>
    %c2_74 = arith.constant 2 : index
    %c0_75 = arith.constant 0 : index
    %c0_76 = arith.constant 0 : index
    %79 = vector.load %arg11[%c2_74, %c0_75, %c0_76] : memref<8x2x32xf32, #tpu.memory_space<vmem>>, vector<1x2x32xf32>
    %80 = vector.shape_cast %79 : vector<1x2x32xf32> to vector<2x32xf32>
    %81 = vector.shape_cast %78 : vector<2x32xf32> to vector<1x2x32xf32>
    tpu.vector_store %arg11[%c2_74, %c0_75, %c0_76], %81 {strides = array<i32>} : memref<8x2x32xf32, #tpu.memory_space<vmem>>, vector<1x2x32xf32>,
    %82 = vector.extract_strided_slice %77 {offsets = [0, 32], sizes = [2, 32], strides = [1, 1]} : vector<2x64xf32> to vector<2x32xf32>
    %c3_77 = arith.constant 3 : index
    %c0_78 = arith.constant 0 : index
    %c0_79 = arith.constant 0 : index
    %83 = vector.load %arg11[%c3_77, %c0_78, %c0_79] : memref<8x2x32xf32, #tpu.memory_space<vmem>>, vector<1x2x32xf32>
    %84 = vector.shape_cast %83 : vector<1x2x32xf32> to vector<2x32xf32>
    %85 = vector.shape_cast %82 : vector<2x32xf32> to vector<1x2x32xf32>
    tpu.vector_store %arg11[%c3_77, %c0_78, %c0_79], %85 {strides = array<i32>} : memref<8x2x32xf32, #tpu.memory_space<vmem>>, vector<1x2x32xf32>,
    %c1_80 = arith.constant 1 : index
    %c0_81 = arith.constant 0 : index
    %c0_82 = arith.constant 0 : index
    %86 = vector.load %arg4[%c1_80, %c0_81, %c0_82] : memref<3x64x64xf32, #tpu.memory_space<vmem>>, vector<1x64x64xf32>
    %87 = vector.shape_cast %86 : vector<1x64x64xf32> to vector<64x64xf32>
    %cst_83 = arith.constant dense<0.000000e+00> : vector<2x64xf32>
    %88 = tpu.matmul %77, %87, %cst_83 {dimension_numbers = #tpu.dot_dimension_numbers<[1], [0], [0], [1], [0, 0, 1, 1], [], []>} : vector<2x64xf32>, vector<64x64xf32>, vector<2x64xf32> -> vector<2x64xf32>
    %89 = arith.addf %88, %45 : vector<2x64xf32>
    %90 = math.tanh %89 : vector<2x64xf32>
    %91 = vector.extract_strided_slice %90 {offsets = [0, 0], sizes = [2, 32], strides = [1, 1]} : vector<2x64xf32> to vector<2x32xf32>
    %c4_84 = arith.constant 4 : index
    %c0_85 = arith.constant 0 : index
    %c0_86 = arith.constant 0 : index
    %92 = vector.load %arg11[%c4_84, %c0_85, %c0_86] : memref<8x2x32xf32, #tpu.memory_space<vmem>>, vector<1x2x32xf32>
    %93 = vector.shape_cast %92 : vector<1x2x32xf32> to vector<2x32xf32>
    %94 = vector.shape_cast %91 : vector<2x32xf32> to vector<1x2x32xf32>
    tpu.vector_store %arg11[%c4_84, %c0_85, %c0_86], %94 {strides = array<i32>} : memref<8x2x32xf32, #tpu.memory_space<vmem>>, vector<1x2x32xf32>,
    %95 = vector.extract_strided_slice %90 {offsets = [0, 32], sizes = [2, 32], strides = [1, 1]} : vector<2x64xf32> to vector<2x32xf32>
    %c5_87 = arith.constant 5 : index
    %c0_88 = arith.constant 0 : index
    %c0_89 = arith.constant 0 : index
    %96 = vector.load %arg11[%c5_87, %c0_88, %c0_89] : memref<8x2x32xf32, #tpu.memory_space<vmem>>, vector<1x2x32xf32>
    %97 = vector.shape_cast %96 : vector<1x2x32xf32> to vector<2x32xf32>
    %98 = vector.shape_cast %95 : vector<2x32xf32> to vector<1x2x32xf32>
    tpu.vector_store %arg11[%c5_87, %c0_88, %c0_89], %98 {strides = array<i32>} : memref<8x2x32xf32, #tpu.memory_space<vmem>>, vector<1x2x32xf32>,
    %c2_90 = arith.constant 2 : index
    %c0_91 = arith.constant 0 : index
    %c0_92 = arith.constant 0 : index
    %99 = vector.load %arg4[%c2_90, %c0_91, %c0_92] : memref<3x64x64xf32, #tpu.memory_space<vmem>>, vector<1x64x64xf32>
    %100 = vector.shape_cast %99 : vector<1x64x64xf32> to vector<64x64xf32>
    %cst_93 = arith.constant dense<0.000000e+00> : vector<2x64xf32>
    %101 = tpu.matmul %90, %100, %cst_93 {dimension_numbers = #tpu.dot_dimension_numbers<[1], [0], [0], [1], [0, 0, 1, 1], [], []>} : vector<2x64xf32>, vector<64x64xf32>, vector<2x64xf32> -> vector<2x64xf32>
    %102 = arith.addf %101, %60 : vector<2x64xf32>
    %103 = math.tanh %102 : vector<2x64xf32>
    %104 = vector.extract_strided_slice %103 {offsets = [0, 0], sizes = [2, 32], strides = [1, 1]} : vector<2x64xf32> to vector<2x32xf32>
    %c6_94 = arith.constant 6 : index
    %c0_95 = arith.constant 0 : index
    %c0_96 = arith.constant 0 : index
    %105 = vector.load %arg11[%c6_94, %c0_95, %c0_96] : memref<8x2x32xf32, #tpu.memory_space<vmem>>, vector<1x2x32xf32>
    %106 = vector.shape_cast %105 : vector<1x2x32xf32> to vector<2x32xf32>
    %107 = vector.shape_cast %104 : vector<2x32xf32> to vector<1x2x32xf32>
    tpu.vector_store %arg11[%c6_94, %c0_95, %c0_96], %107 {strides = array<i32>} : memref<8x2x32xf32, #tpu.memory_space<vmem>>, vector<1x2x32xf32>,
    %108 = vector.extract_strided_slice %103 {offsets = [0, 32], sizes = [2, 32], strides = [1, 1]} : vector<2x64xf32> to vector<2x32xf32>
    %c7_97 = arith.constant 7 : index
    %c0_98 = arith.constant 0 : index
    %c0_99 = arith.constant 0 : index
    %109 = vector.load %arg11[%c7_97, %c0_98, %c0_99] : memref<8x2x32xf32, #tpu.memory_space<vmem>>, vector<1x2x32xf32>
    %110 = vector.shape_cast %109 : vector<1x2x32xf32> to vector<2x32xf32>
    %111 = vector.shape_cast %108 : vector<2x32xf32> to vector<1x2x32xf32>
    tpu.vector_store %arg11[%c7_97, %c0_98, %c0_99], %111 {strides = array<i32>} : memref<8x2x32xf32, #tpu.memory_space<vmem>>, vector<1x2x32xf32>,
    %c0_100 = arith.constant 0 : index
    %c0_101 = arith.constant 0 : index
    %c0_102 = arith.constant 0 : index
    %112 = vector.load %arg2[%c0_100, %c0_101, %c0_102] : memref<2x8x32xf32, #tpu.memory_space<vmem>>, vector<2x8x32xf32>
    %113 = vector.shape_cast %0 : vector<2x32xf32> to vector<2x1x32xf32>
    %114 = vector.broadcast %113 : vector<2x1x32xf32> to vector<2x8x32xf32>
    %115 = arith.mulf %112, %114 : vector<2x8x32xf32>
    %cst_103 = arith.constant dense<0.000000e+00> : vector<2x8xf32>
    %116 = vector.multi_reduction <add>, %115, %cst_103 [2] : vector<2x8x32xf32> to vector<2x8xf32>
    %cst_104 = arith.constant dense<0xFF800000> : vector<2xf32>
    %117 = vector.multi_reduction <maximumf>, %116, %cst_104 [1] : vector<2x8xf32> to vector<2xf32>
    %118 = vector.shape_cast %117 : vector<2xf32> to vector<2x1xf32>
    %119 = vector.broadcast %118 : vector<2x1xf32> to vector<2x8xf32>
    %120 = arith.subf %116, %119 : vector<2x8xf32>
    %121 = math.exp %120 : vector<2x8xf32>
    %cst_105 = arith.constant dense<0.000000e+00> : vector<2xf32>
    %122 = vector.multi_reduction <add>, %121, %cst_105 [1] : vector<2x8xf32> to vector<2xf32>
    %123 = vector.shape_cast %122 : vector<2xf32> to vector<2x1xf32>
    %124 = vector.broadcast %123 : vector<2x1xf32> to vector<2x8xf32>
    %125 = arith.divf %121, %124 : vector<2x8xf32>
    %126 = vector.shape_cast %125 : vector<2x8xf32> to vector<2x8x1xf32>
    %127 = vector.broadcast %126 : vector<2x8x1xf32> to vector<2x8x32xf32>
    %128 = arith.mulf %127, %112 : vector<2x8x32xf32>
    %cst_106 = arith.constant dense<0.000000e+00> : vector<2x32xf32>
    %129 = vector.multi_reduction <add>, %128, %cst_106 [1] : vector<2x8x32xf32> to vector<2x32xf32>
    %c0_107 = arith.constant 0 : index
    %c0_108 = arith.constant 0 : index
    %130 = vector.load %arg7[%c0_107, %c0_108] : memref<64x32xf32, #tpu.memory_space<vmem>>, vector<64x32xf32>
    %cst_109 = arith.constant dense<0.000000e+00> : vector<2x32xf32>
    %131 = tpu.matmul %103, %130, %cst_109 {dimension_numbers = #tpu.dot_dimension_numbers<[1], [0], [0], [1], [0, 0, 1, 1], [], []>} : vector<2x64xf32>, vector<64x32xf32>, vector<2x32xf32> -> vector<2x32xf32>
    %c0_110 = arith.constant 0 : index
    %c0_111 = arith.constant 0 : index
    %132 = vector.load %arg8[%c0_110, %c0_111] : memref<32x32xf32, #tpu.memory_space<vmem>>, vector<32x32xf32>
    %cst_112 = arith.constant dense<0.000000e+00> : vector<2x32xf32>
    %133 = tpu.matmul %129, %132, %cst_112 {dimension_numbers = #tpu.dot_dimension_numbers<[1], [0], [0], [1], [0, 0, 1, 1], [], []>} : vector<2x32xf32>, vector<32x32xf32>, vector<2x32xf32> -> vector<2x32xf32>
    %134 = arith.addf %131, %133 : vector<2x32xf32>
    %c0_113 = arith.constant 0 : index
    %c0_114 = arith.constant 0 : index
    %135 = vector.load %arg9[%c0_113, %c0_114] : memref<1x32xf32, #tpu.memory_space<vmem>>, vector<1x32xf32>
    %136 = vector.broadcast %135 : vector<1x32xf32> to vector<2x32xf32>
    %137 = arith.addf %134, %136 : vector<2x32xf32>
    %c0_115 = arith.constant 0 : index
    %c0_116 = arith.constant 0 : index
    %138 = vector.load %arg10[%c0_115, %c0_116] : memref<2x32xf32, #tpu.memory_space<vmem>>, vector<2x32xf32>
    tpu.vector_store %arg10[%c0_115, %c0_116], %137 {strides = array<i32>} : memref<2x32xf32, #tpu.memory_space<vmem>>, vector<2x32xf32>,
    return
  }
}

</mosaic_0001>

<bundles_post_ra>
// kernel: tpu_custom_call.1
= control target key start
LH: loop header
LB: loop body
LE: loop exit
PB: predicated region body
PF: predicated region fallthrough
CT: control target
= control target key end

     0   :  { %17 = vsyncpa [#allocation3], 0  ;;  %s2302_s0 = inlined_call_operand.hbm [shape: f32[2,32], index: 0, kind: input, shape index: {}]   ;;  %s2303_s1 = inlined_call_operand.vmem [shape: f32[8,2,32], index: 1, kind: input, shape index: {}]   ;;  %s2304_s2 = inlined_call_operand.vmem [shape: f32[2,8,32], index: 2, kind: input, shape index: {}]   ;;  %s2305_s3 = inlined_call_operand.vmem [shape: f32[32,64], index: 3, kind: input, shape index: {}]   ;;  %s2306_s4 = inlined_call_operand.hbm [shape: f32[3,64,64], index: 4, kind: input, shape index: {}]   ;;  %s2307_s5 = inlined_call_operand.hbm [shape: f32[8,32,32], index: 5, kind: input, shape index: {}]   ;;  %s2308_s6 = inlined_call_operand.vmem [shape: f32[4,1,64], index: 6, kind: input, shape index: {}]   ;;  %s2309_s7 = inlined_call_operand.vmem [shape: f32[64,32], index: 7, kind: input, shape index: {}]   ;;  %s2310_s8 = inlined_call_operand.vmem [shape: f32[32,32], index: 8, kind: input, shape index: {}]   ;;  %s2311_s9 = inlined_call_operand.vmem [shape: f32[1,32], index: 9, kind: input, shape index: {}]   ;;  %s2312_s10 = inlined_call_operand.hbm [shape: f32[2,32], index: 10, kind: output, shape index: {0}]   ;;  %s2313_s11 = inlined_call_operand.hbm [shape: f32[8,2,32], index: 11, kind: output, shape index: {1}]  }
   0x1   :  { %18 = vsyncpa [#allocation6], 0 }
   0x2   :  { %19 = vsyncpa [#allocation4], 0 }
   0x3   :  { %20 = vsyncpa [#allocation10], 0  ;;  %s1910_s17 = smov [#allocation5]  }
   0x4   :  { %s42_s18 = sshll.u32 %s1910_s17, 4  ;;  %s43_s18 = int_to_ptr.vmem [resolvable:$true] %s42_s18 }
   0x5   :  { %s1810_s19 = scalar_lea.vmem %s43_s18, 3072  ;;  %p1815_p1 = scmp.lt.s32.totalorder %s43_s18, %s43_s18 }
   0x6   :  { %p1811_p0 = scmp.ne.s32.totalorder %s43_s18, %s1810_s19  ;;  %p1816_p2 = scmp.lt.s32.totalorder %s1810_s19, %s1810_s19 }
   0x8   :  { %p1817_p3 = por %p1816_p2, %p1815_p1 }
   0xa   :  { %p1818_p4 = pnand %p1817_p3, %p1811_p0 }
   0xc   :  { %1821 = shalt.err (!%p1818_p4)
}
   0xd   :  { %s1911_s20 = smov 128   ;;  %s1912_s21 = smov 8  }
   0xe   :  { %48 = dma.hbm_to_vmem [thread:$0]  %s2306_s4, 3072, %s43_s18, [#allocation6], %s1911_s20, %s1911_s20, %s1912_s21  }
   0xf   :  { %s1913_s24 = smov [#allocation2]   ;;  %s1914_s26 = smov [#allocation7]  }
  0x10   :  { %s27_s25 = sshll.u32 %s1913_s24, 4  ;;  %s54_s27 = sshll.u32 %s1914_s26, 4  ;;  %s28_s25 = int_to_ptr.vmem [resolvable:$true] %s27_s25  ;;  %s55_s27 = int_to_ptr.vmem [resolvable:$true] %s54_s27 }
  0x11   :  { %s1830_s28 = scalar_lea.vmem %s28_s25, 32  ;;  %p1835_p6 = scmp.lt.s32.totalorder %s28_s25, %s28_s25 }
  0x12   :  { %p1831_p5 = scmp.ne.s32.totalorder %s28_s25, %s1830_s28  ;;  %p1836_p7 = scmp.lt.s32.totalorder %s1830_s28, %s1830_s28 }
  0x14   :  { %p1837_p8 = por %p1836_p7, %p1835_p6 }
  0x16   :  { %p1838_p9 = pnand %p1837_p8, %p1831_p5 }
  0x18   :  { %1841 = shalt.err (!%p1838_p9)
}
  0x19   :  { %30 = dma.hbm_to_vmem [thread:$0]  %s2302_s0, 32, %s28_s25, [#allocation3]  }
  0x1a   :  { %s1850_s12 = scalar_lea.vmem %s55_s27, 4096  ;;  %p1855_p11 = scmp.lt.s32.totalorder %s55_s27, %s55_s27 }
  0x1b   :  { %p1851_p10 = scmp.ne.s32.totalorder %s55_s27, %s1850_s12  ;;  %p1856_p12 = scmp.lt.s32.totalorder %s1850_s12, %s1850_s12 }
  0x1d   :  { %p1857_p13 = por %p1856_p12, %p1855_p11 }
  0x1f   :  { %p1858_p0 = pnand %p1857_p13, %p1851_p10 }
  0x21   :  { %1861 = shalt.err (!%p1858_p0)
}
  0x22   :  { %60 = dma.hbm_to_vmem [thread:$0]  %s2307_s5, 4096, %s55_s27, [#allocation6], %s1911_s20, %s1911_s20, %s1912_s21  }
  0x23   :  { %1902 = dma.done.wait [#allocation3], 32  }
  0x24   :  { %1903 = vsyncadd [#allocation3], 4294967264 }
  0x25   :  { %1904 = dma.done.wait [#allocation6], 7168  }
  0x26   :  { %1905 = vsyncadd [#allocation6], 4294960128  ;;  %v1915_v0 = vmov 0.0   ;;  %vm1916_vm0 = vmmov 0   ;;  %v1917_v1 = vmov 1966171168   ;;  %v1134_v3 = vlaneseq }
  0x27   :  { %1584 = vmatprep.subr.mxu1 %v1915_v0  ;;  %1592 = vmatprep.mubr.msk.f32.mxu1 %vm1916_vm0, %v1915_v0  ;;  %v1132_v2 = vunpack.c.l.s4 %v1917_v1  ;;  %v83_v4 = vld [vmem:[#allocation7 + $0x18] sm:$0xff]  ;;  %v82_v5 = vld [vmem:[#allocation7 + $0x10] sm:$0xff]  ;;  %v81_v8 = vld [vmem:[#allocation7 + $0x8] sm:$0xff]  ;;  %vm84_vm1 = vcmask 261120   ;;  %vm1183_vm2 = vcmask 1041409   ;;  %vm1186_vm3 = vcmask 58368  }
  0x28   :  { %1606 = vmatprep.subr.mxu0 %v1915_v0  ;;  %1614 = vmatprep.mubr.msk.f32.mxu0 %vm1916_vm0, %v1915_v0  ;;  %v2000_v7 = vshrl.u32 %v1134_v3, 7  ;;  %v80_v9 = vld [vmem:[#allocation7] sm:$0xff]  ;;  %v79_v11 = vld [vmem:[%s2303_s1] sm:$0x3]  ;;  %v163_v15 = vld [vmem:[#allocation7 + $0x30] sm:$0xff]  ;;  %vm867_vm4 = vcmask 523264  }
  0x29   :  { %v1133_v6 = vunpack.c.0.s8 %v1132_v2  ;;  %1585 = vmatpush3.msra.mxu1 %v83_v4  ;;  %v164_v12 = vld [vmem:[#allocation7 + $0x38] sm:$0xff]  ;;  %v256_v18 = vld [vmem:[#allocation7 + $0x50] sm:$0xff]  ;;  %v162_v19 = vld [vmem:[#allocation7 + $0x28] sm:$0xff]  ;;  %vm851_vm5 = vcmask 254976  }
  0x2a   :  { %1586 = vmatprep.subr.mxu1 %v1915_v0  ;;  %v257_v13 = vld [vmem:[#allocation7 + $0x58] sm:$0xff]  ;;  %v2015_v17 = vsub.s32 0, %v2000_v7  ;;  %v255_v21 = vld [vmem:[#allocation7 + $0x48] sm:$0xff]  ;;  %v161_v24 = vld [vmem:[#allocation7 + $0x20] sm:$0xff] }
  0x2b   :  { %1587 = vmatpush3.msra.mxu1 %v82_v5  ;;  %v1136_v10 = vsub.s32 %v1133_v6, %v2000_v7  ;;  %1607 = vmatpush3.msra.mxu0 %v257_v13  ;;  %v2009_v14 = vld [vmem:[#allocation2] sm:$0x3]  ;;  %v254_v27 = vld [vmem:[#allocation7 + $0x40] sm:$0xff]  ;;  %v336_v33 = vld [vmem:[#allocation7 + $0x70] sm:$0xff] }
  0x2c   :  { %1588 = vmatprep.subr.mxu1 %v1915_v0  ;;  %1608 = vmatprep.subr.mxu0 %v1915_v0  ;;  %v2024_v23 = vld [vmem:[%s2304_s2] sm:$0xff]  ;;  %v2035_v29 = vld [vmem:[%s2304_s2 + $0x8] sm:$0xff]  ;;  %v430_v43 = vld [vmem:[#allocation7 + $0x90] sm:$0xff]  ;;  %s1920_s2 = smov 96  }
  0x2d   :  { %1589 = vmatpush3.msra.mxu1 %v81_v8  ;;  %v1137_v16 = vrot.slane %v2009_v14, %v1136_v10  ;;  %1609 = vmatpush3.msra.mxu0 %v256_v18  ;;  %v1470_v28 = vld [vmem:[%s2303_s1 + $0x2] sm:$0x3]  ;;  %v337_v30 = vld [vmem:[#allocation7 + $0x78] sm:$0xff]  ;;  %v1473_v36 = vld [vmem:[%s2303_s1 + $0x4] sm:$0x3] }
  0x2e   :  { %1590 = vmatprep.subr.mxu1 %v1915_v0  ;;  %1610 = vmatprep.subr.mxu0 %v1915_v0  ;;  %v335_v37 = vld [vmem:[#allocation7 + $0x68] sm:$0xff]  ;;  %v431_v38 = vld [vmem:[#allocation7 + $0x98] sm:$0xff]  ;;  %v334_v40 = vld [vmem:[#allocation7 + $0x60] sm:$0xff] }
  0x2f   :  { %1591 = vmatpush3.msra.mxu1 %v80_v9  ;;  %v1145_v20 = vrot.slane %v1137_v16, %v1136_v10  ;;  %v1138_v22 = vcombine.high %v1137_v16, %v1137_v16  ;;  %1611 = vmatpush3.msra.mxu0 %v255_v21  ;;  %v1475_v41 = vld [vmem:[%s2303_s1 + $0x6] sm:$0x3]  ;;  %v511_v42 = vld [vmem:[#allocation7 + $0xb8] sm:$0xff]  ;;  %v510_v44 = vld [vmem:[#allocation7 + $0xb0] sm:$0xff] }
  0x30   :  { %1593 = vmatmul.mubr.msk.f32.vlgmr.msra.gmra.mxu1 %vm84_vm1, %v79_v11  ;;  %1595 = vmatprep.subr.mxu1 %v1915_v0  ;;  %v429_v45 = vld [vmem:[#allocation7 + $0x88] sm:$0xff]  ;;  %v428_v47 = vld [vmem:[#allocation7 + $0x80] sm:$0xff]  ;;  %v605_v51 = vld [vmem:[#allocation7 + $0xd8] sm:$0xff] }
  0x31   :  { %1596 = vmatpush3.msra.mxu1 %v164_v12  ;;  %1603 = vmatprep.mubr.msk.f32.mxu1 %vm1916_vm0, %v1915_v0  ;;  %v1156_v25 = vrot.slane %v1145_v20, %v2015_v17  ;;  %v1152_v26 = vrot.slane %v1138_v22, %v1136_v10  ;;  %v509_v46 = vld [vmem:[#allocation7 + $0xa8] sm:$0xff]  ;;  %v508_v48 = vld [vmem:[#allocation7 + $0xa0] sm:$0xff]  ;;  %v604_v52 = vld [vmem:[#allocation7 + $0xd0] sm:$0xff] }
  0x32   :  { %1597 = vmatprep.subr.mxu1 %v1915_v0  ;;  %1612 = vmatprep.subr.mxu0 %v1915_v0  ;;  %v1481_v49 = vld [vmem:[%s2303_s1 + $0xa] sm:$0x3]  ;;  %v1479_v50 = vld [vmem:[%s2303_s1 + $0x8] sm:$0x3]  ;;  %v1485_v55 = vld [vmem:[%s2303_s1 + $0xc] sm:$0x3] }
  0x33   :  { %1598 = vmatpush3.msra.mxu1 %v163_v15  ;;  %v1163_v31 = vmul.f32 %v1156_v25, %v2024_v23  ;;  %v1160_v32 = vrot.slane %v1152_v26, %v2015_v17  ;;  %1613 = vmatpush3.msra.mxu0 %v254_v27  ;;  %v603_v53 = vld [vmem:[#allocation7 + $0xc8] sm:$0xff]  ;;  %v602_v54 = vld [vmem:[#allocation7 + $0xc0] sm:$0xff]  ;;  %v776_v56 = vld [vmem:[%s2305_s3 + $0x18] sm:$0xff]  ;;  %v1174_v27 = vand.u32 127, %v1134_v3  ;;  %v1919_v3 = vmov 0  }
  0x34   :  { %1599 = vmatprep.subr.mxu1 %v1915_v0  ;;  %1628 = vmatprep.subr.mxu0 %v1915_v0  ;;  %v775_v57 = vld [vmem:[%s2305_s3 + $0x10] sm:$0xff]  ;;  %v774_v58 = vld [vmem:[%s2305_s3 + $0x8] sm:$0xff]  ;;  %v773_v59 = vld [vmem:[%s2305_s3] sm:$0xff] }
  0x35   :  { %1600 = vmatpush3.msra.mxu1 %v162_v19  ;;  %v1165_v34 = vsel %vm84_vm1, %v1163_v31, 0.0  ;;  %v1164_v35 = vmul.f32 %v1160_v32, %v2035_v29  ;;  %1615 = vmatmul.mubr.msk.f32.vlgmr.msra.gmra.mxu0 %vm84_vm1, %v1473_v36  ;;  %v685_v60 = vld [vmem:[#allocation7 + $0xf8] sm:$0xff]  ;;  %v684_v61 = vld [vmem:[#allocation7 + $0xf0] sm:$0xff]  ;;  %v683_v62 = vld [vmem:[#allocation7 + $0xe8] sm:$0xff] }
  0x36   :  { %1601 = vmatprep.subr.mxu1 %v1915_v0  ;;  %1166 = vadd.xlane.f32.xlu1 %v1165_v34  ;;  %v682_v63 = vld [vmem:[#allocation7 + $0xe0] sm:$0xff]  ;;  %v1487_v1 = vld [vmem:[%s2303_s1 + $0xe] sm:$0x3]  ;;  %v866_v2 = vld [vmem:[#allocation5 + $0x38] sm:$0xff]  ;;  %s1918_s1 = smov 32  }
  0x37   :  { %1602 = vmatpush3.msra.mxu1 %v161_v24  ;;  %v1168_v39 = vsel %vm84_vm1, %v1164_v35, 0.0  ;;  %1629 = vmatpush3.msra.mxu0 %v431_v38  ;;  %v865_v5 = vld [vmem:[#allocation5 + $0x30] sm:$0xff]  ;;  %v864_v8 = vld [vmem:[#allocation5 + $0x28] sm:$0xff]  ;;  %v863_v9 = vld [vmem:[#allocation5 + $0x20] sm:$0xff] }
  0x38   :  { %1604 = vmatmul.mubr.msk.f32.vlgmr.msra.gmra.mxu1 %vm84_vm1, %v1470_v28  ;;  %1617 = vmatprep.subr.mxu1 %v1915_v0  ;;  %v862_v10 = vld [vmem:[#allocation5 + $0x18] sm:$0xff]  ;;  %v861_v11 = vld [vmem:[#allocation5 + $0x10] sm:$0xff]  ;;  %v859_v16 = vld [vmem:[#allocation5] sm:$0xff] }
  0x39   :  { %1618 = vmatpush3.msra.mxu1 %v337_v30  ;;  %1625 = vmatprep.mubr.msk.f32.mxu1 %vm1916_vm0, %v1915_v0  ;;  %v2144_v30 = vsub.s32 %v1174_v27, %v2000_v7  ;;  %v1042_v27 = vld [vmem:[#allocation5 + $0x90] sm:$0xff] }
  0x3a   :  { %1619 = vmatprep.subr.mxu1 %v1915_v0  ;;  %1169 = vadd.xlane.f32.xlu1 %v1168_v39  ;;  %v1472_v39 = vld [vmem:[%s2308_s6] ss:$0 sm:$0xff] }
  0x3b   :  { %1620 = vmatpush3.msra.mxu1 %v336_v33  ;;  %1630 = vmatprep.subr.mxu0 %v1915_v0 }
  0x3c   :  { %1621 = vmatprep.subr.mxu1 %v1915_v0  ;;  %1631 = vmatpush3.msra.mxu0 %v430_v43 }
  0x3d   :  { %1622 = vmatpush3.msra.mxu1 %v335_v37  ;;  %1632 = vmatprep.subr.mxu0 %v1915_v0 }
  0x3e   :  { %1623 = vmatprep.subr.mxu1 %v1915_v0  ;;  %1633 = vmatpush3.msra.mxu0 %v429_v45 }
  0x3f   :  { %1624 = vmatpush3.msra.mxu1 %v334_v40  ;;  %1634 = vmatprep.subr.mxu0 %v1915_v0 }
  0x40   :  { %1626 = vmatmul.mubr.msk.f32.vlgmr.msra.gmra.mxu1 %vm84_vm1, %v1475_v41  ;;  %1639 = vmatprep.subr.mxu1 %v1915_v0 }
  0x41   :  { %1640 = vmatpush3.msra.mxu1 %v511_v42  ;;  %1647 = vmatprep.mubr.msk.f32.mxu1 %vm1916_vm0, %v1915_v0 }
  0x42   :  { %1641 = vmatprep.subr.mxu1 %v1915_v0  ;;  %1635 = vmatpush3.msra.mxu0 %v428_v47 }
  0x43   :  { %1642 = vmatpush3.msra.mxu1 %v510_v44  ;;  %1636 = vmatprep.mubr.msk.f32.mxu0 %vm1916_vm0, %v1915_v0 }
  0x44   :  { %1643 = vmatprep.subr.mxu1 %v1915_v0  ;;  %1650 = vmatprep.subr.mxu0 %v1915_v0 }
  0x45   :  { %1644 = vmatpush3.msra.mxu1 %v509_v46  ;;  %1637 = vmatmul.mubr.msk.f32.vlgmr.msra.gmra.mxu0 %vm84_vm1, %v1479_v50  ;;  %v1197_v46 = vsub.s32 1, %v2000_v7  ;;  %v1280_v7 = vld [vmem:[%s2310_s8 + $0x18] sm:$0xff] }
  0x46   :  { %1645 = vmatprep.subr.mxu1 %v1915_v0  ;;  %1651 = vmatpush3.msra.mxu0 %v605_v51 }
  0x47   :  { %1646 = vmatpush3.msra.mxu1 %v508_v48  ;;  %1658 = vmatprep.mubr.msk.f32.mxu0 %vm1916_vm0, %v1915_v0 }
  0x48   :  { %1648 = vmatmul.mubr.msk.f32.vlgmr.msra.gmra.mxu1 %vm84_vm1, %v1481_v49  ;;  %1661 = vmatprep.subr.mxu1 %v1915_v0 }
  0x49   :  { %1652 = vmatprep.subr.mxu0 %v1915_v0  ;;  %1669 = vmatprep.mubr.msk.f32.mxu1 %vm1916_vm0, %v1915_v0 }
  0x4a   :  { %1653 = vmatpush3.msra.mxu0 %v604_v52  ;;  %1662 = vmatpush3.msra.mxu1 %v685_v60  ;;  %v955_v60 = vld [vmem:[#allocation5 + $0x68] sm:$0xff] }
  0x4b   :  { %1654 = vmatprep.subr.mxu0 %v1915_v0  ;;  %1663 = vmatprep.subr.mxu1 %v1915_v0 }
  0x4c   :  { %1655 = vmatpush3.msra.mxu0 %v603_v53  ;;  %1664 = vmatpush3.msra.mxu1 %v684_v61  ;;  %v954_v61 = vld [vmem:[#allocation5 + $0x60] sm:$0xff] }
  0x4d   :  { %1656 = vmatprep.subr.mxu0 %v1915_v0  ;;  %1665 = vmatprep.subr.mxu1 %v1915_v0 }
  0x4e   :  { %1657 = vmatpush3.msra.mxu0 %v602_v54  ;;  %1666 = vmatpush3.msra.mxu1 %v683_v62  ;;  %v953_v62 = vld [vmem:[#allocation5 + $0x58] sm:$0xff] }
  0x4f   :  { %1672 = vmatprep.subr.mxu0 %v1915_v0  ;;  %1659 = vmatmul.mubr.msk.f32.vlgmr.msra.gmra.mxu0 %vm84_vm1, %v1485_v55 }
  0x50   :  { %1673 = vmatpush3.msra.mxu0 %v776_v56  ;;  %1680 = vmatprep.mubr.msk.f32.mxu0 %vm1916_vm0, %v1915_v0 }
  0x51   :  { %1674 = vmatprep.subr.mxu0 %v1915_v0  ;;  %1667 = vmatprep.subr.mxu1 %v1915_v0 }
  0x52   :  { %1675 = vmatpush3.msra.mxu0 %v775_v57  ;;  %1668 = vmatpush3.msra.mxu1 %v682_v63  ;;  %v952_v63 = vld [vmem:[#allocation5 + $0x50] sm:$0xff] }
  0x53   :  { %1676 = vmatprep.subr.mxu0 %v1915_v0  ;;  %1670 = vmatmul.mubr.msk.f32.vlgmr.msra.gmra.mxu1 %vm84_vm1, %v1487_v1  ;;  %v951_v1 = vld [vmem:[#allocation5 + $0x48] sm:$0xff] }
  0x54   :  { %1677 = vmatpush3.msra.mxu0 %v774_v58  ;;  %1683 = vmatprep.subr.mxu1 %v1915_v0  ;;  %v957_v58 = vld [vmem:[#allocation5 + $0x78] sm:$0xff] }
  0x55   :  { %1678 = vmatprep.subr.mxu0 %v1915_v0  ;;  %1699 = vmatprep.mubr.msk.f32.mxu1 %vm1916_vm0, %v1915_v0 }
  0x56   :  { %1679 = vmatpush3.msra.mxu0 %v773_v59  ;;  %1684 = vmatpush3.msra.mxu1 %v866_v2  ;;  %v956_v59 = vld [vmem:[#allocation5 + $0x70] sm:$0xff]  ;;  %v950_v2 = vld [vmem:[#allocation5 + $0x40] sm:$0xff] }
  0x57   :  { %1681 = vmatmul.mubr.msk.f32.vlgmr.msra.gmra.mxu0 %vm84_vm1, %v2009_v14  ;;  %1702 = vmatprep.subr.mxu0 %v1915_v0  ;;  %v860_v14 = vld [vmem:[#allocation5 + $0x8] sm:$0xff] }
  0x58   :  { %1718 = vmatprep.mubr.msk.f32.mxu0 %vm1916_vm0, %v1915_v0  ;;  %1685 = vmatprep.subr.mxu1 %v1915_v0 }
  0x59   :  { %1686 = vmatpush3.msra.mxu1 %v865_v5  ;;  %1784 = vset.pattern.permute.xlu1 %v1919_v3 }
  0x5a   :  { %1687 = vmatprep.subr.mxu1 %v1915_v0  ;;  %1785 = vset.pattern.permute.xlu0 %v1919_v3  ;;  %v1278_v3 = vld [vmem:[%s2310_s8 + $0x8] sm:$0xff] }
  0x5b   :  { %1688 = vmatpush3.msra.mxu1 %v864_v8  ;;  %1703 = vmatpush3.msra.mxu0 %v957_v58  ;;  %v1478_v8 = vld [vmem:[%s2308_s6 + $0x1] ss:$0 sm:$0xff] }
  0x5c   :  { %1689 = vmatprep.subr.mxu1 %v1915_v0  ;;  %1704 = vmatprep.subr.mxu0 %v1915_v0 }
  0x5d   :  { %1690 = vmatpush3.msra.mxu1 %v863_v9  ;;  %1705 = vmatpush3.msra.mxu0 %v956_v59 }
  0x5e   :  { %1691 = vmatprep.subr.mxu1 %v1915_v0  ;;  %1706 = vmatprep.subr.mxu0 %v1915_v0 }
  0x5f   :  { %1692 = vmatpush3.msra.mxu1 %v862_v10  ;;  %1707 = vmatpush3.msra.mxu0 %v955_v60 }
  0x60   :  { %1693 = vmatprep.subr.mxu1 %v1915_v0  ;;  %1708 = vmatprep.subr.mxu0 %v1915_v0 }
  0x61   :  { %1694 = vmatpush3.msra.mxu1 %v861_v11  ;;  %1709 = vmatpush3.msra.mxu0 %v954_v61 }
  0x62   :  { %1695 = vmatprep.subr.mxu1 %v1915_v0  ;;  %1710 = vmatprep.subr.mxu0 %v1915_v0 }
  0x63   :  { %1696 = vmatpush3.msra.mxu1 %v860_v14  ;;  %1711 = vmatpush3.msra.mxu0 %v953_v62 }
  0x64   :  { %1697 = vmatprep.subr.mxu1 %v1915_v0  ;;  %1712 = vmatprep.subr.mxu0 %v1915_v0 }
  0x65   :  { %1698 = vmatpush3.msra.mxu1 %v859_v16  ;;  %1713 = vmatpush3.msra.mxu0 %v952_v63 }
  0x66   :  { %1721 = vmatprep.subr.mxu1 %v1915_v0  ;;  %1714 = vmatprep.subr.mxu0 %v1915_v0 }
  0x67   :  { %1715 = vmatpush3.msra.mxu0 %v951_v1 }
  0x68   :  { %1716 = vmatprep.subr.mxu0 %v1915_v0 }
  0x69   :  { %1717 = vmatpush3.msra.mxu0 %v950_v2  ;;  %v1276_v2 = vld [vmem:[%s2309_s7 + $0x38] sm:$0xff] }
  0x6a   :  { %1740 = vmatprep.subr.mxu0 %v1915_v0 }
  0xbf   :  { %v1167_v26 = vpop.xlane.xlu1 %1166 }
  0xc0   :  { %v1178_v33 = vrot.slane %v1167_v26, %v2144_v30 }
  0xc3   :  { %v1170_v31 = vpop.xlane.xlu1 %1169 }
  0xc4   :  { %v1182_v34 = vrot.slane %v1170_v31, %v2144_v30 }
  0xc6   :  { %v1184_v36 = vsel %vm1183_vm2, %v1182_v34, %v1178_v33 }
  0xc7   :  { %v1187_v38 = vsel %vm1186_vm3, %v1184_v36, -inf }
  0xf0   :  { %v154_v4 = vpop.f32.mrf.mxu1 }
  0xf2   :  { %v1594_v6 = vpop.f32.mrf.mxu1 }
  0xf5   :  { %v2132_v15 = vpop.f32.mrf.mxu0 }
  0xf7   :  { %v1616_v18 = vpop.f32.mrf.mxu0 }
  0xf8   :  { %v234_v12 = vpop.f32.mrf.mxu1 }
  0xf9   :  { %239 = vrot.lane.b32.xlu0 %v234_v12, %s1918_s1 }
  0xfa   :  { %v1605_v13 = vpop.f32.mrf.mxu1 }
 0x100   :  { %v407_v19 = vpop.f32.mrf.mxu1 }
 0x101   :  { %412 = vrot.lane.b32.xlu0 %v407_v19, %s1918_s1 }
 0x102   :  { %v1627_v20 = vpop.f32.mrf.mxu1 }
 0x103   :  { %v1047_v20 = vld [vmem:[#allocation5 + $0xb8] sm:$0xff] }
 0x105   :  { %v2138_v22 = vpop.f32.mrf.mxu0 }
 0x107   :  { %v1638_v25 = vpop.f32.mrf.mxu0 }
 0x108   :  { %v581_v21 = vpop.f32.mrf.mxu1  ;;  %v1044_v25 = vld [vmem:[#allocation5 + $0xa0] sm:$0xff] }
 0x109   :  { %586 = vrot.lane.b32.xlu1 %v581_v21, %s1918_s1  ;;  %v1046_v21 = vld [vmem:[#allocation5 + $0xb0] sm:$0xff] }
 0x10a   :  { %v1649_v24 = vpop.f32.mrf.mxu1 }
 0x10b   :  { %v1045_v24 = vld [vmem:[#allocation5 + $0xa8] sm:$0xff] }
 0x10f   :  { %v2141_v28 = vpop.f32.mrf.mxu0 }
 0x111   :  { %v1660_v32 = vpop.f32.mrf.mxu0 }
 0x113   :  { %v2166_v53 = vpop.f32.mrf.mxu1 }
 0x115   :  { %v1671_v55 = vpop.f32.mrf.mxu1 }
 0x117   :  { %v846_v35 = vpop.f32.mrf.mxu0 }
 0x119   :  { %v1682_v37 = vpop.f32.mrf.mxu0 }
 0x120   :  { %1188 = vmax.xlane.f32.xlu0 %v1187_v38 }
 0x16b   :  { %v240_v40 = vpop.permute.xlu0 %239 }
 0x16c   :  { %v242_v41 = vsel %vm84_vm1, %v154_v4, %v240_v40 }
 0x16d   :  { %v250_v42 = vadd.f32 %v1472_v39, %v242_v41  ;;  %v1277_v39 = vld [vmem:[%s2310_s8] sm:$0xff] }
 0x16e   :  { %v1484_v41 = vld [vmem:[%s2308_s6 + $0x2] ss:$0 sm:$0xff] }
 0x16f   :  { %v847_v43 = vadd.f32 %v846_v35, %v250_v42 }
 0x171   :  { %1786 = vtanh.f32 %v847_v43 }
 0x173   :  { %v413_v45 = vpop.permute.xlu0 %412 }
 0x174   :  { %v415_v6 = vsel %vm84_vm1, %v2132_v15, %v413_v45 }
 0x175   :  { %v424_v12 = vadd.f32 %v1478_v8, %v415_v6  ;;  %v1274_v6 = vld [vmem:[%s2309_s7 + $0x28] sm:$0xff]  ;;  %v1273_v8 = vld [vmem:[%s2309_s7 + $0x20] sm:$0xff] }
 0x17b   :  { %v2182_v4 = vpop.permute.xlu1 %586 }
 0x17c   :  { %v589_v40 = vsel %vm84_vm1, %v2138_v22, %v2182_v4 }
 0x17d   :  { %v598_v42 = vadd.f32 %v1484_v41, %v589_v40 }
 0x17e   :  { %v2154_v44 = vpop.eup %1786 }
 0x17f   :  { %1700 = vmatmul.mubr.msk.f32.vlgmr.msra.gmra.mxu1 %vm867_vm4, %v2154_v44  ;;  %852 = vst.msk [vmem:[#allocation9] sm:$0x3] %vm851_vm5, %v2154_v44 }
 0x180   :  { %1737 = vmatprep.mubr.msk.f32.mxu1 %vm1916_vm0, %v1915_v0  ;;  %1722 = vmatpush3.msra.mxu1 %v1047_v20 }
 0x181   :  { %1723 = vmatprep.subr.mxu1 %v1915_v0 }
 0x182   :  { %1724 = vmatpush3.msra.mxu1 %v1046_v21 }
 0x183   :  { %1725 = vmatprep.subr.mxu1 %v1915_v0 }
 0x184   :  { %1726 = vmatpush3.msra.mxu1 %v1045_v24 }
 0x185   :  { %1727 = vmatprep.subr.mxu1 %v1915_v0 }
 0x186   :  { %1728 = vmatpush3.msra.mxu1 %v1044_v25 }
 0x187   :  { %1729 = vmatprep.subr.mxu1 %v1915_v0 }
 0x1a9   :  { %v1189_v47 = vpop.xlane.xlu0 %1188 }
 0x1aa   :  { %v1194_v48 = vrot.slane %v1189_v47, %v2015_v17  ;;  %v1198_v49 = vrot.slane %v1189_v47, %v1197_v46 }
 0x1ac   :  { %v1201_v50 = vsub.f32 %v1167_v26, %v1194_v48  ;;  %v1202_v51 = vsub.f32 %v1170_v31, %v1198_v49  ;;  %v1043_v26 = vld [vmem:[#allocation5 + $0x98] sm:$0xff]  ;;  %v1040_v31 = vld [vmem:[#allocation5 + $0x80] sm:$0xff] }
 0x1ad   :  { %1730 = vmatpush3.msra.mxu1 %v1043_v26 }
 0x1ae   :  { %v1203_v52 = vmul.f32 1.442695, %v1201_v50  ;;  %v1205_v54 = vmul.f32 1.442695, %v1202_v51  ;;  %1731 = vmatprep.subr.mxu1 %v1915_v0 }
 0x1af   :  { %1732 = vmatpush3.msra.mxu1 %v1042_v27 }
 0x1b0   :  { %1788 = vpow2.f32 %v1203_v52  ;;  %1733 = vmatprep.subr.mxu1 %v1915_v0 }
 0x1b1   :  { %1790 = vpow2.f32 %v1205_v54 }
 0x1bd   :  { %v2168_v56 = vpop.eup %1788 }
 0x1be   :  { %1210 = vperm.xlu1 %1784, %v2168_v56   ;;  %v2171_v57 = vpop.eup %1790 }
 0x1c2   :  { %1213 = vperm.xlu1 %1784, %v2171_v57  }
 0x239   :  { %v1211_v5 = vpop.permute.xlu1 %1210 }
 0x23a   :  { %v1218_v10 = vrot.slane %v1211_v5, %v2144_v30  ;;  %v1275_v5 = vld [vmem:[%s2309_s7 + $0x30] sm:$0xff] }
 0x23d   :  { %v1214_v9 = vpop.permute.xlu1 %1213 }
 0x23e   :  { %v1222_v11 = vrot.slane %v1214_v9, %v2144_v30  ;;  %v1041_v30 = vld [vmem:[#allocation5 + $0x88] sm:$0xff]  ;;  %v1272_v9 = vld [vmem:[%s2309_s7 + $0x18] sm:$0xff] }
 0x23f   :  { %v936_v13 = vpop.f32.mrf.mxu1  ;;  %1734 = vmatpush3.msra.mxu1 %v1041_v30 }
 0x240   :  { %v937_v14 = vadd.f32 %v936_v13, %v424_v12  ;;  %v1223_v16 = vsel %vm1183_vm2, %v1222_v11, %v1218_v10  ;;  %1735 = vmatprep.subr.mxu1 %v1915_v0  ;;  %v1271_v10 = vld [vmem:[%s2309_s7 + $0x10] sm:$0xff]  ;;  %v1270_v11 = vld [vmem:[%s2309_s7 + $0x8] sm:$0xff]  ;;  %v1269_v12 = vld [vmem:[%s2309_s7] sm:$0xff]  ;;  %s1921_s7 = smov [#allocation9]  }
 0x241   :  { %v1701_v18 = vpop.f32.mrf.mxu1  ;;  %v1225_v19 = vsel %vm1186_vm3, %v1223_v16, 0.0  ;;  %1736 = vmatpush3.msra.mxu1 %v1040_v31  ;;  %v1490_v16 = vld [vmem:[%s2308_s6 + $0x3] ss:$0 sm:$0xff]  ;;  %s1452_s24 = sshll.u32 %s1921_s7, 4  ;;  %s1453_s24 = int_to_ptr.vmem [resolvable:$true] %s1452_s24 }
 0x242   :  { %1792 = vtanh.f32 %v937_v14  ;;  %1226 = vadd.xlane.f32.xlu1 %v1225_v19  ;;  %s1862_s6 = scalar_lea.vmem %s1453_s24, 256  ;;  %p1867_p2 = scmp.lt.s32.totalorder %s1453_s24, %s1453_s24 }
 0x243   :  { %p1863_p1 = scmp.ne.s32.totalorder %s1453_s24, %s1862_s6  ;;  %p1868_p3 = scmp.lt.s32.totalorder %s1862_s6, %s1862_s6 }
 0x245   :  { %p1869_p4 = por %p1868_p3, %p1867_p2 }
 0x247   :  { %p1870_p5 = pnand %p1869_p4, %p1863_p1 }
 0x24f   :  { %v1793_v15 = vpop.eup %1792 }
 0x250   :  { %1719 = vmatmul.mubr.msk.f32.vlgmr.msra.gmra.mxu0 %vm867_vm4, %v1793_v15  ;;  %942 = vst.msk [vmem:[#allocation9 + $0x4] sm:$0x3] %vm851_vm5, %v1793_v15 }
 0x251   :  { %1748 = vmatprep.mubr.msk.f32.mxu0 %vm1916_vm0, %v1915_v0  ;;  %1741 = vmatpush3.msra.mxu0 %v1280_v7 }
 0x252   :  { %1742 = vmatprep.subr.mxu0 %v1915_v0 }
 0x2cb   :  { %v1227_v32 = vpop.xlane.xlu1 %1226 }
 0x2cc   :  { %v1232_v33 = vrot.slane %v1227_v32, %v2015_v17  ;;  %v1236_v34 = vrot.slane %v1227_v32, %v1197_v46  ;;  %v1279_v17 = vld [vmem:[%s2310_s8 + $0x10] sm:$0xff] }
 0x2cd   :  { %1743 = vmatpush3.msra.mxu0 %v1279_v17 }
 0x2ce   :  { %1794 = vrcp.f32 %v1232_v33  ;;  %1744 = vmatprep.subr.mxu0 %v1915_v0 }
 0x2cf   :  { %1796 = vrcp.f32 %v1236_v34  ;;  %1745 = vmatpush3.msra.mxu0 %v1278_v3 }
 0x2d0   :  { %1746 = vmatprep.subr.mxu0 %v1915_v0 }
 0x2d1   :  { %1747 = vmatpush3.msra.mxu0 %v1277_v39 }
 0x2d2   :  { %1751 = vmatprep.subr.mxu0 %v1915_v0 }
 0x2db   :  { %v1795_v35 = vpop.eup %1794 }
 0x2dc   :  { %v1797_v36 = vpop.eup %1796  ;;  %v1240_v37 = vmul.f32 %v1795_v35, %v2168_v56 }
 0x2dd   :  { %v1242_v38 = vmul.f32 %v1797_v36, %v2171_v57 }
 0x2de   :  { %1245 = vperm.xlu0 %1785, %v1240_v37  }
 0x2df   :  { %1250 = vperm.xlu1 %1784, %v1242_v38  }
 0x2e2   :  { %760 = vrot.lane.b32.xlu0 %v2166_v53, %s1918_s1 }
 0x2e3   :  { %854 = vrot.lane.b32.xlu1 %v2154_v44, %s1920_s2 }
 0x2e6   :  { %944 = vrot.lane.b32.xlu0 %v1793_v15, %s1920_s2 }
 0x310   :  { %v1026_v43 = vpop.f32.mrf.mxu0 }
 0x311   :  { %v1027_v44 = vadd.f32 %v1026_v43, %v598_v42 }
 0x312   :  { %v1720_v45 = vpop.f32.mrf.mxu0 }
 0x313   :  { %1798 = vtanh.f32 %v1027_v44 }
 0x320   :  { %v1799_v46 = vpop.eup %1798 }
 0x321   :  { %1034 = vrot.lane.b32.xlu1 %v1799_v46, %s1920_s2  ;;  %1738 = vmatmul.mubr.msk.f32.vlgmr.msra.gmra.mxu1 %vm867_vm4, %v1799_v46  ;;  %1032 = vst.msk [vmem:[#allocation9 + $0x8] sm:$0x3] %vm851_vm5, %v1799_v46 }
 0x359   :  { %v1246_v47 = vpop.permute.xlu0 %1245 }
 0x35a   :  { %v1251_v48 = vpop.permute.xlu1 %1250  ;;  %v1253_v22 = vmul.f32 %v1246_v47, %v2024_v23 }
 0x35b   :  { %v1254_v49 = vmul.f32 %v1251_v48, %v2035_v29 }
 0x35c   :  { %v1255_v50 = vsel %vm84_vm1, %v1253_v22, 0.0 }
 0x35d   :  { %v1262_v51 = vsel %vm84_vm1, %v1254_v49, 0.0  ;;  %v1256_v52 = vrot.slane %v1255_v50, 4  ;;  %v761_v53 = vpop.permute.xlu0 %760 }
 0x35e   :  { %v1263_v54 = vrot.slane %v1262_v51, 4  ;;  %v855_v55 = vpop.permute.xlu1 %854  ;;  %v763_v14 = vsel %vm84_vm1, %v2141_v28, %v761_v53 }
 0x35f   :  { %v1257_v56 = vadd.f32 %v1256_v52, %v1255_v50  ;;  %858 = vst.msk [vmem:[#allocation9 + $0x2] sm:$0x3] %vm851_vm5, %v855_v55  ;;  %v772_v18 = vadd.f32 %v1490_v16, %v763_v14 }
 0x360   :  { %v1264_v57 = vadd.f32 %v1263_v54, %v1262_v51 }
 0x361   :  { %v1258_v58 = vrot.slane %v1257_v56, 2  ;;  %v945_v59 = vpop.permute.xlu0 %944 }
 0x362   :  { %v1265_v60 = vrot.slane %v1264_v57, 2  ;;  %948 = vst.msk [vmem:[#allocation9 + $0x6] sm:$0x3] %vm851_vm5, %v945_v59 }
 0x363   :  { %v1259_v23 = vadd.f32 %v1258_v58, %v1257_v56 }
 0x364   :  { %v1266_v61 = vadd.f32 %v1265_v60, %v1264_v57 }
 0x365   :  { %v1260_v29 = vrot.slane %v1259_v23, 1 }
 0x366   :  { %v1267_v62 = vrot.slane %v1266_v61, 1 }
 0x367   :  { %v1261_v63 = vadd.f32 %v1260_v29, %v1259_v23 }
 0x368   :  { %v1268_v1 = vadd.f32 %v1267_v62, %v1266_v61 }
 0x36a   :  { %v1283_v4 = vsel %vm1183_vm2, %v1268_v1, %v1261_v63 }
 0x36b   :  { %1749 = vmatmul.mubr.msk.f32.vlgmr.msra.gmra.mxu0 %vm84_vm1, %v1283_v4 }
 0x36c   :  { %1752 = vmatpush3.msra.mxu0 %v1276_v2  ;;  %1767 = vmatprep.mubr.msk.f32.mxu0 %vm1916_vm0, %v1915_v0 }
 0x36d   :  { %1753 = vmatprep.subr.mxu0 %v1915_v0 }
 0x36e   :  { %1754 = vmatpush3.msra.mxu0 %v1275_v5 }
 0x36f   :  { %1755 = vmatprep.subr.mxu0 %v1915_v0 }
 0x370   :  { %1756 = vmatpush3.msra.mxu0 %v1274_v6 }
 0x371   :  { %1757 = vmatprep.subr.mxu0 %v1915_v0 }
 0x372   :  { %1758 = vmatpush3.msra.mxu0 %v1273_v8 }
 0x373   :  { %1759 = vmatprep.subr.mxu0 %v1915_v0 }
 0x374   :  { %1760 = vmatpush3.msra.mxu0 %v1272_v9 }
 0x375   :  { %1761 = vmatprep.subr.mxu0 %v1915_v0 }
 0x376   :  { %1762 = vmatpush3.msra.mxu0 %v1271_v10 }
 0x377   :  { %1763 = vmatprep.subr.mxu0 %v1915_v0 }
 0x378   :  { %1764 = vmatpush3.msra.mxu0 %v1270_v11 }
 0x379   :  { %1765 = vmatprep.subr.mxu0 %v1915_v0 }
 0x37a   :  { %1766 = vmatpush3.msra.mxu0 %v1269_v12 }
 0x393   :  { %v1035_v13 = vpop.permute.xlu1 %1034 }
 0x394   :  { %1038 = vst.msk [vmem:[#allocation9 + $0xa] sm:$0x3] %vm851_vm5, %v1035_v13 }
 0x3e1   :  { %v1116_v19 = vpop.f32.mrf.mxu1 }
 0x3e2   :  { %v1117_v15 = vadd.f32 %v1116_v19, %v772_v18 }
 0x3e3   :  { %v1739_v20 = vpop.f32.mrf.mxu1 }
 0x3e4   :  { %1800 = vtanh.f32 %v1117_v15 }
 0x3f1   :  { %v1801_v21 = vpop.eup %1800 }
 0x3f2   :  { %1122 = vst.msk [vmem:[#allocation9 + $0xc] sm:$0x3] %vm851_vm5, %v1801_v21  ;;  %1124 = vrot.lane.b32.xlu0 %v1801_v21, %s1920_s2  ;;  %1768 = vmatmul.mubr.msk.f32.vlgmr.msra.gmra.mxu0 %vm867_vm4, %v1801_v21 }
 0x42b   :  { %v1352_v0 = vpop.f32.mrf.mxu0 }
 0x42d   :  { %v1750_v24 = vpop.f32.mrf.mxu0 }
 0x464   :  { %v1125_v28 = vpop.permute.xlu0 %1124 }
 0x465   :  { %1128 = vst.msk [vmem:[#allocation9 + $0xe] sm:$0x3] %vm851_vm5, %v1125_v28 }
 0x466   :  { %1873 = shalt.err (!%p1870_p5)
}
 0x467   :  { %s1922_s25 = smov 2   ;;  %v1497_v26 = vld [vmem:[%s2311_s9] ss:$0 sm:$0xff]  ;;  %s1923_s29 = smov [#allocation8]  }
 0x468   :  { %1458 = dma.vmem_to_hbm [thread:$0]  %s1453_s24, 256, %s2313_s11, [#allocation10], %s1918_s1, %s1918_s1, %s1922_s25  }
 0x469   :  { %s1443_s8 = sshll.u32 %s1923_s29, 4  ;;  %s1444_s8 = int_to_ptr.vmem [resolvable:$true] %s1443_s8 }
 0x46a   :  { %s1882_s30 = scalar_lea.vmem %s1444_s8, 32  ;;  %p1887_p7 = scmp.lt.s32.totalorder %s1444_s8, %s1444_s8 }
 0x46b   :  { %p1883_p6 = scmp.ne.s32.totalorder %s1444_s8, %s1882_s30  ;;  %p1888_p8 = scmp.lt.s32.totalorder %s1882_s30, %s1882_s30 }
 0x46d   :  { %p1889_p9 = por %p1888_p8, %p1887_p7 }
 0x46f   :  { %p1890_p10 = pnand %p1889_p9, %p1883_p6 }
 0x4b2   :  { %v1424_v25 = vpop.f32.mrf.mxu0 }
 0x4b3   :  { %v1425_v27 = vadd.f32 %v1424_v25, %v1352_v0 }
 0x4b4   :  { %v1769_v30 = vpop.f32.mrf.mxu0 }
 0x4b5   :  { %v1435_v31 = vadd.f32 %v1497_v26, %v1425_v27 }
 0x4b7   :  { %1436 = vst.msk [vmem:[#allocation8] sm:$0x3] %vm851_vm5, %v1435_v31 }
 0x4b8   :  { %1893 = shalt.err (!%p1890_p10)
}
 0x4b9   :  { %1446 = dma.vmem_to_hbm [thread:$0]  %s1444_s8, 32, %s2312_s10, [#allocation4]  }
 0x4ba   :  { %1906 = dma.done.wait [#allocation4], 32  }
 0x4bb   :  { %1907 = vsyncadd [#allocation4], 4294967264 }
 0x4bc   :  { %1908 = dma.done.wait [#allocation10], 256  }
 0x4bd   :  { %1909 = vsyncadd [#allocation10], 4294967040 }
 0x4be   :  { %1465 = vsyncpa [#allocation3], 1 }
 0x4bf   :  { %1466 = vsyncpa [#allocation6], 1 }
 0x4c0   :  { %1467 = vsyncpa [#allocation4], 1 }
 0x4c1   :  { %1468 = vsyncpa [#allocation10], 1 }

</bundles_post_ra>
